<compile_context>
chip_gen: v5e
topology: v5e:2x2
jax: 0.10.0
libtpu: 0.0.40
codegen_flags: <defaults>
</compile_context>

<pallas_src>
import math

import jax
import jax.numpy as jnp
from jax.experimental import pallas as pl
from jax.experimental.pallas import tpu as pltpu


def _layer_norm(x, gamma, beta, eps=1e-5):
    # nn.LayerNorm semantics: biased variance over the last dim, eps=1e-5.
    mean = jnp.mean(x, axis=-1, keepdims=True)
    var = jnp.mean((x - mean) ** 2, axis=-1, keepdims=True)
    return (x - mean) * jax.lax.rsqrt(var + eps) * gamma + beta


def _qkv_proj_kernel(x_ref, w_ref, b_ref, qkv_ref):
    """One grid step == (batch element, row tile): qkv = x @ [Wq|Wk|Wv] + [bq|bk|bv]."""
    qkv = jnp.dot(x_ref[0], w_ref[...],
                  preferred_element_type=jnp.float32) + b_ref[...]
    qkv_ref[0] = qkv.astype(qkv_ref.dtype)


def _attn_ffn_kernel(xq_ref, q_ref, k_ref, v_ref, npm_ref, am_ref,
                     wfc_ref, bfc_ref, ln1g_ref, ln1b_ref,
                     w1_ref, b1_ref, w2_ref, b2_ref, ln2g_ref, ln2b_ref,
                     out_ref, attn_ref):
    """One grid step == (batch element, query-row tile)."""
    n_head, d_v, d_model = wfc_ref.shape

    xq = xq_ref[0].astype(jnp.float32)   # (TQ, D)  residual path, f32
    npm = npm_ref[0]                     # (TQ, 1)  non-pad mask (1.0 keep / 0.0 pad)
    amask = am_ref[0]                    # (MR, L)  attn-mask rows, MR in {1, TQ}; 1.0 == masked

    q = q_ref[0]                         # (H, TQ, d_k) bf16
    k = k_ref[0]                         # (H, L,  d_k) bf16
    v = v_ref[0]                         # (H, L,  d_v) bf16
    d_k = q.shape[-1]

    # ---- Multi-head self attention (head-batched, bf16 MXU, f32 accumulate) ----
    inv_temp = jnp.float32(1.0 / math.sqrt(d_k))
    scores = jnp.einsum('hqe,hke->hqk', q, k,
                        preferred_element_type=jnp.float32) * inv_temp
    # Masking / softmax in f32 (finite fill so max-subtraction never NaNs).
    scores = jnp.where(amask[None] > 0, jnp.float32(-1e30), scores)
    scores = scores - jnp.max(scores, axis=-1, keepdims=True)
    e = jnp.exp(scores)
    # Exact reciprocal on the small (H, TQ, 1) denominator: rows sum to 1.
    attn = e * (1.0 / jnp.sum(e, axis=-1, keepdims=True))
    attn_ref[:, 0, :, :] = attn.astype(attn_ref.dtype)           # (H, TQ, L)

    ctx = jnp.einsum('hqk,hke->hqe', attn.astype(jnp.bfloat16), v,
                     preferred_element_type=jnp.float32)          # (H, TQ, d_v)
    ctx_b = ctx.astype(jnp.bfloat16)

    # Output projection: sum_h ctx_h @ Wfc_h accumulated head-by-head into one
    # (TQ, D) f32 accumulator (no (H, TQ, D) intermediate, no head concat).
    mha = jnp.dot(ctx_b[0], wfc_ref[0], preferred_element_type=jnp.float32)
    for h in range(1, n_head):
        mha = mha + jnp.dot(ctx_b[h], wfc_ref[h], preferred_element_type=jnp.float32)
    mha = mha + bfc_ref[...]
    mha = _layer_norm(mha + xq, ln1g_ref[...], ln1b_ref[...])
    mha = mha * npm                                               # enc_output *= non_pad_mask

    # ---- Position-wise feed forward (Conv1d k=1 == per-position linear) ----
    h1 = jnp.dot(mha.astype(jnp.bfloat16), w1_ref[...],
                 preferred_element_type=jnp.float32) + b1_ref[...]
    h1 = jnp.maximum(h1, 0.0)
    h2 = jnp.dot(h1.astype(jnp.bfloat16), w2_ref[...],
                 preferred_element_type=jnp.float32) + b2_ref[...]
    ffn = _layer_norm(h2 + mha, ln2g_ref[...], ln2b_ref[...])

    out_ref[0] = (ffn * npm).astype(out_ref.dtype)                # *= non_pad_mask


def encoder_layer(x, non_pad_mask, slf_attn_mask, params, *,
                  n_head, d_k, d_v, q_tile=128,
                  attn_dtype=jnp.bfloat16, vmem_limit_bytes=None):
    """x: (B, L, D) f32; non_pad_mask: (B, L, 1); slf_attn_mask: (B, 1, L) or (B, L, L),
    float with 1.0 == masked position (PyTorch bool mask -> float).

    q_tile: 256 recommended on v6e (128 MiB VMEM, 256-wide MXU); 64-128 on v7x
    (64 MiB VMEM) -- pass vmem_limit_bytes explicitly when tuning for v7x."""
    B, L, D = x.shape
    d_inner = params["w1"].shape[1]

    tq = min(q_tile, L)
    assert L % tq == 0, "sequence length must be a multiple of the query tile"
    n_qt = L // tq

    f32, bf16 = jnp.float32, jnp.bfloat16
    cparams = pltpu.CompilerParams(
        dimension_semantics=("parallel", "parallel"),
        vmem_limit_bytes=vmem_limit_bytes)

    # ---- Kernel 1: fused QKV projection (single lane-dense matmul) ----
    hk, hv = n_head * d_k, n_head * d_v
    ht = 2 * hk + hv
    w_qkv = jnp.concatenate(
        [params["wq"], params["wk"], params["wv"]], axis=1).astype(bf16)   # (D, 2*hk+hv)
    b_qkv = jnp.concatenate(
        [params["bq"], params["bk"], params["bv"]], axis=1).astype(f32)    # (1, 2*hk+hv)
    x_bf = x.astype(bf16)

    qkv = pl.pallas_call(
        _qkv_proj_kernel,
        grid=(B, n_qt),
        in_specs=[
            pl.BlockSpec((1, tq, D), lambda b, i: (b, i, 0)),
            pl.BlockSpec((D, ht), lambda b, i: (0, 0), pipeline_mode=pl.Buffered(1)),
            pl.BlockSpec((1, ht), lambda b, i: (0, 0), pipeline_mode=pl.Buffered(1)),
        ],
        out_specs=pl.BlockSpec((1, tq, ht), lambda b, i: (b, i, 0)),
        out_shape=jax.ShapeDtypeStruct((B, L, ht), bf16),
        compiler_params=cparams,
    )(x_bf, w_qkv, b_qkv)

    # Head split / head-major transpose in XLA -- layout plumbing only, no compute.
    q = qkv[..., :hk].reshape(B, L, n_head, d_k).transpose(0, 2, 1, 3)        # (B,H,L,dk)
    k = qkv[..., hk:2 * hk].reshape(B, L, n_head, d_k).transpose(0, 2, 1, 3)  # (B,H,L,dk)
    v = qkv[..., 2 * hk:].reshape(B, L, n_head, d_v).transpose(0, 2, 1, 3)    # (B,H,L,dv)

    # ---- Kernel 2: attention + output projection + FFN ----
    wfc_h = params["wfc"].reshape(n_head, d_v, D).astype(bf16)
    w1 = params["w1"].astype(bf16)
    w2 = params["w2"].astype(bf16)

    npm = non_pad_mask.astype(f32)
    amask = slf_attn_mask.astype(f32)
    if amask.shape[1] == 1:      # key-padding mask: one row per batch, broadcast in-kernel
        mask_spec = pl.BlockSpec((1, 1, L), lambda b, qi: (b, 0, 0))
    else:                        # full (B, L, L) mask: tile the query rows
        mask_spec = pl.BlockSpec((1, tq, L), lambda b, qi: (b, qi, 0))

    def const_spec(shape):
        nd = len(shape)
        return pl.BlockSpec(shape, lambda b, qi, _nd=nd: (0,) * _nd,
                            pipeline_mode=pl.Buffered(1))

    in_specs = [
        pl.BlockSpec((1, tq, D), lambda b, qi: (b, qi, 0)),                 # x tile (f32 residual)
        pl.BlockSpec((1, n_head, tq, d_k), lambda b, qi: (b, 0, qi, 0)),    # q tile (head-major)
        pl.BlockSpec((1, n_head, L, d_k), lambda b, qi: (b, 0, 0, 0)),      # k full sequence
        pl.BlockSpec((1, n_head, L, d_v), lambda b, qi: (b, 0, 0, 0)),      # v full sequence
        pl.BlockSpec((1, tq, 1), lambda b, qi: (b, qi, 0)),                 # non_pad_mask tile
        mask_spec,                                                          # attention mask
        const_spec((n_head, d_v, D)), const_spec((1, D)),                   # fc weight / bias
        const_spec((1, D)), const_spec((1, D)),                             # layer_norm 1
        const_spec((D, d_inner)), const_spec((1, d_inner)),                 # w_1 (conv1d k=1)
        const_spec((d_inner, D)), const_spec((1, D)),                       # w_2 (conv1d k=1)
        const_spec((1, D)), const_spec((1, D)),                             # layer_norm 2
    ]
    out_specs = [
        pl.BlockSpec((1, tq, D), lambda b, qi: (b, qi, 0)),                 # enc_output
        pl.BlockSpec((n_head, 1, tq, L), lambda b, qi: (0, b, qi, 0)),      # attention weights
    ]
    out_shape = [
        jax.ShapeDtypeStruct((B, L, D), x.dtype),
        jax.ShapeDtypeStruct((n_head, B, L, L), attn_dtype),
    ]

    enc_out, attn = pl.pallas_call(
        _attn_ffn_kernel,
        grid=(B, n_qt),
        in_specs=in_specs,
        out_specs=out_specs,
        out_shape=out_shape,
        compiler_params=cparams,
    )(x, q, k, v, npm, amask,
      wfc_h, params["bfc"].astype(f32),
      params["ln1g"].astype(f32), params["ln1b"].astype(f32),
      w1, params["b1"].astype(f32), w2, params["b2"].astype(f32),
      params["ln2g"].astype(f32), params["ln2b"].astype(f32))

    # PyTorch returns attn as (n_head * B, L, L), head-major.
    return enc_out, attn.reshape(n_head * B, L, L)


def _reference(x, npm, amask, params, n_head, d_k, d_v):
    """Pure-JAX f32 reference of the PyTorch EncoderLayer forward (eval mode)."""
    B, L, D = x.shape

    def ln(t, g, b):
        m = t.mean(-1, keepdims=True)
        v = ((t - m) ** 2).mean(-1, keepdims=True)
        return (t - m) / jnp.sqrt(v + 1e-5) * g + b

    q = x @ params["wq"] + params["bq"]
    k = x @ params["wk"] + params["bk"]
    v = x @ params["wv"] + params["bv"]
    qh = q.reshape(B, L, n_head, d_k).transpose(2, 0, 1, 3)
    kh = k.reshape(B, L, n_head, d_k).transpose(2, 0, 1, 3)
    vh = v.reshape(B, L, n_head, d_v).transpose(2, 0, 1, 3)
    scores = jnp.einsum('hbqd,hbkd->hbqk', qh, kh) / math.sqrt(d_k)
    scores = jnp.where(amask[None] > 0, -1e30, scores)
    attn = jax.nn.softmax(scores, axis=-1)
    ctx = jnp.einsum('hbqk,hbkd->hbqd', attn, vh)
    ctx = ctx.transpose(1, 2, 0, 3).reshape(B, L, n_head * d_v)
    mha = ctx @ params["wfc"] + params["bfc"]
    mha = ln(mha + x, params["ln1g"], params["ln1b"]) * npm
    h1 = jnp.maximum(mha @ params["w1"] + params["b1"], 0.0)
    h2 = h1 @ params["w2"] + params["b2"]
    out = ln(h2 + mha, params["ln2g"], params["ln2b"]) * npm
    return out, attn.reshape(n_head * B, L, L)


if __name__ == "__main__":
    B, L = 2, 8
    d_model, d_inner, n_head, d_k, d_v = 32, 64, 4, 16, 16

    key = jax.random.PRNGKey(0)
    ks = jax.random.split(key, 16)

    def nrm(k, shape, scale=0.1):
        return (scale * jax.random.normal(k, shape)).astype(jnp.float32)

    params = {
        "wq": nrm(ks[0], (d_model, n_head * d_k)),
        "bq": nrm(ks[1], (1, n_head * d_k)),
        "wk": nrm(ks[2], (d_model, n_head * d_k)),
        "bk": nrm(ks[3], (1, n_head * d_k)),
        "wv": nrm(ks[4], (d_model, n_head * d_v)),
        "bv": nrm(ks[5], (1, n_head * d_v)),
        "wfc": nrm(ks[6], (n_head * d_v, d_model)),
        "bfc": nrm(ks[7], (1, d_model)),
        "ln1g": jnp.ones((1, d_model), jnp.float32),
        "ln1b": jnp.zeros((1, d_model), jnp.float32),
        "w1": nrm(ks[8], (d_model, d_inner)),
        "b1": nrm(ks[9], (1, d_inner)),
        "w2": nrm(ks[10], (d_inner, d_model)),
        "b2": nrm(ks[11], (1, d_model)),
        "ln2g": jnp.ones((1, d_model), jnp.float32),
        "ln2b": jnp.zeros((1, d_model), jnp.float32),
    }

    x = jax.random.normal(ks[12], (B, L, d_model), jnp.float32)

    # Batch 1 has its last two positions padded.
    non_pad_mask = jnp.ones((B, L, 1), jnp.float32).at[1, L - 2:, :].set(0.0)
    # Key-padding attention mask as a broadcastable (B, 1, L) row (1.0 == masked).
    slf_attn_mask = jnp.zeros((B, 1, L), jnp.float32).at[1, :, L - 2:].set(1.0)

    enc_out, attn = encoder_layer(
        x, non_pad_mask, slf_attn_mask, params,
        n_head=n_head, d_k=d_k, d_v=d_v)
    jax.block_until_ready((enc_out, attn))

    assert enc_out.shape == (B, L, d_model)
    assert attn.shape == (n_head * B, L, L)

    ref_out, ref_attn = _reference(x, non_pad_mask, slf_attn_mask, params,
                                   n_head, d_k, d_v)
    assert float(jnp.max(jnp.abs(enc_out - ref_out))) < 0.1, "enc_output mismatch"
    assert float(jnp.max(jnp.abs(attn.astype(jnp.float32) - ref_attn))) < 0.05, \
        "attention mismatch"

    print("KERNEL_OK")
</pallas_src>

<mosaic_0001>
module attributes {stable_mosaic.version = 11 : i64} {
  func.func @_qkv_proj_kernel(%arg0: i32, %arg1: i32, %arg2: memref<1x8x32xbf16, #tpu.memory_space<vmem>>, %arg3: memref<32x192xbf16, #tpu.memory_space<vmem>>, %arg4: memref<1x192xf32, #tpu.memory_space<vmem>>, %arg5: memref<1x8x192xbf16, #tpu.memory_space<vmem>>) attributes {dimension_semantics = [#tpu.dimension_semantics<parallel>, #tpu.dimension_semantics<parallel>], iteration_bounds = array<i64: 2, 1>, scalar_prefetch = 0 : i64, scratch_operands = 0 : i64, tpu.core_type = #tpu.core_type<tc>, window_params = [{transform_indices = @transform_0, window_bounds = array<i64: 1, 8, 32>}, {pipeline_mode = #tpu.pipeline_mode<synchronous>, transform_indices = @transform_1, window_bounds = array<i64: 32, 192>}, {pipeline_mode = #tpu.pipeline_mode<synchronous>, transform_indices = @transform_2, window_bounds = array<i64: 1, 192>}, {transform_indices = @transform_3, window_bounds = array<i64: 1, 8, 192>}]} {
    %c0 = arith.constant 0 : index
    %c0_0 = arith.constant 0 : index
    %c0_1 = arith.constant 0 : index
    %0 = vector.load %arg2[%c0, %c0_0, %c0_1] : memref<1x8x32xbf16, #tpu.memory_space<vmem>>, vector<1x8x32xbf16>
    %1 = vector.shape_cast %0 : vector<1x8x32xbf16> to vector<8x32xbf16>
    %c0_2 = arith.constant 0 : index
    %c0_3 = arith.constant 0 : index
    %2 = vector.load %arg3[%c0_2, %c0_3] : memref<32x192xbf16, #tpu.memory_space<vmem>>, vector<32x192xbf16>
    %cst = arith.constant dense<0.000000e+00> : vector<8x192xf32>
    %3 = tpu.matmul %1, %2, %cst {dimension_numbers = #tpu.dot_dimension_numbers<[1], [0], [0], [1], [0, 0, 1, 1], [], []>} : vector<8x32xbf16>, vector<32x192xbf16>, vector<8x192xf32> -> vector<8x192xf32>
    %c0_4 = arith.constant 0 : index
    %c0_5 = arith.constant 0 : index
    %4 = vector.load %arg4[%c0_4, %c0_5] : memref<1x192xf32, #tpu.memory_space<vmem>>, vector<1x192xf32>
    %5 = vector.broadcast %4 : vector<1x192xf32> to vector<8x192xf32>
    %6 = arith.addf %3, %5 : vector<8x192xf32>
    %7 = arith.truncf %6 : vector<8x192xf32> to vector<8x192xbf16>
    %c0_6 = arith.constant 0 : index
    %c0_7 = arith.constant 0 : index
    %c0_8 = arith.constant 0 : index
    %8 = vector.load %arg5[%c0_6, %c0_7, %c0_8] : memref<1x8x192xbf16, #tpu.memory_space<vmem>>, vector<1x8x192xbf16>
    %9 = vector.shape_cast %8 : vector<1x8x192xbf16> to vector<8x192xbf16>
    %10 = vector.shape_cast %7 : vector<8x192xbf16> to vector<1x8x192xbf16>
    tpu.vector_store %arg5[%c0_6, %c0_7, %c0_8], %10 {strides = array<i32>} : memref<1x8x192xbf16, #tpu.memory_space<vmem>>, vector<1x8x192xbf16>,
    return
  }
  func.func @transform_0(%arg0: i32, %arg1: i32) -> (i32, i32, i32) {
    %c0_i32 = arith.constant 0 : i32
    %c0_i32_0 = arith.constant 0 : i32
    return %arg0, %arg1, %c0_i32 : i32, i32, i32
  }
  func.func @transform_1(%arg0: i32, %arg1: i32) -> (i32, i32) {
    %c0_i32 = arith.constant 0 : i32
    %c0_i32_0 = arith.constant 0 : i32
    %c0_i32_1 = arith.constant 0 : i32
    return %c0_i32, %c0_i32_0 : i32, i32
  }
  func.func @transform_2(%arg0: i32, %arg1: i32) -> (i32, i32) {
    %c0_i32 = arith.constant 0 : i32
    %c0_i32_0 = arith.constant 0 : i32
    %c0_i32_1 = arith.constant 0 : i32
    return %c0_i32, %c0_i32_0 : i32, i32
  }
  func.func @transform_3(%arg0: i32, %arg1: i32) -> (i32, i32, i32) {
    %c0_i32 = arith.constant 0 : i32
    %c0_i32_0 = arith.constant 0 : i32
    return %arg0, %arg1, %c0_i32 : i32, i32, i32
  }
}

</mosaic_0001>

<bundles_post_ra>
// kernel: tpu_custom_call.1
= control target key start
LH: loop header
LB: loop body
LE: loop exit
PB: predicated region body
PF: predicated region fallthrough
CT: control target
= control target key end

     0   :  { %8 = vsyncpa [#allocation3], 0  ;;  %s896_s0 = inlined_call_operand.hbm [shape: bf16[2,8,32], index: 0, kind: input, shape index: {}]   ;;  %s897_s1 = inlined_call_operand.hbm [shape: bf16[32,192], index: 1, kind: input, shape index: {}]   ;;  %s898_s2 = inlined_call_operand.hbm [shape: f32[1,192], index: 2, kind: input, shape index: {}]   ;;  %s899_s3 = inlined_call_operand.hbm [shape: bf16[2,8,192], index: 3, kind: output, shape index: {}]  }
   0x1   :  { %10 = vsyncpa [#allocation3 + $0x1], 0 }
   0x2   :  { %11 = vsyncpa [#allocation6], 0 }
   0x3   :  { %12 = vsyncpa [#allocation4], 0 }
   0x4   :  { %14 = vsyncpa [#allocation4 + $0x1], 0  ;;  %s751_s12 = smov 0   ;;  %s753_s13 = smov 0  }
   0x5   :  { %s755_s14 = smov 0   ;;  %s757_s15 = smov 0  }
   0x6   :  { %s759_s16 = smov 0   ;;  %s761_s17 = smov 0  }
   0x7 LB: > { %s423_s18 = sadd.s32 4294967295, %s725_s17   ;;  %p425_p0 = scmp.ge.s32.totalorder %s725_s17, 1  ;;  %s725_s17 = sphi %s761_s17, %s20_s17   ;;  %s721_s16 = sphi %s759_s16, %s909_s16   ;;  %s717_s15 = sphi %s757_s15, %s908_s15   ;;  %s713_s14 = sphi %s755_s14, %s907_s14   ;;  %s709_s13 = sphi %s753_s13, %s906_s13   ;;  %s705_s12 = sphi %s751_s12, %s905_s12  }
   0x8   : > { %p785_p1 = scmp.eq.s32.totalorder %s423_s18, 0  ;;  %p135_p2 = scmp.lt.s32.totalorder %s725_s17, 3 }
   0x9   : > { %s146_s22 = sshll.u32 %s897_s1, 4  ;;  %s727_s24 = smov [#allocation5]   ;;  %s147_s22 = int_to_ptr.hbm [resolvable:$true] %s146_s22 }
   0xa   : > { %p793_p3 = pnand %p425_p0, %p135_p2  ;;  %s148_s25 = sshll.u32 %s727_s24, 4  ;;  %s149_s25 = int_to_ptr.vmem [resolvable:$true] %s148_s25 }
   0xb   : > { %p428_p6 = scmp.ge.s32.totalorder %s725_s17, 2  ;;  %s161_s28 = sshll.u32 %s898_s2, 4  ;;  %s162_s28 = int_to_ptr.hbm [resolvable:$true] %s161_s28 }
   0xc   : > { %p476_p4 = pneg %p793_p3  ;;  %s728_s29 = smov 128  }
   0xd   : > { %s729_s30 = smov 8   ;;  %s730_s4 = smov [#allocation7]  }
   0xe   : > { %p477_p5 = pnand %p476_p4, %p785_p1  ;;  %s163_s5 = sshll.u32 %s730_s4, 4  ;;  %s164_s5 = int_to_ptr.vmem [resolvable:$true] %s163_s5 }
   0xf   : > { %s32_s6 = sadd.s32 1, %s721_s16  ;;  %s424_s7 = sadd.s32 4294967294, %s725_s17  }
  0x10   : > { %479 = dma.hbm_to_vmem [thread:$0]  (!%p477_p5), %s147_s22, 512, %s149_s25, [#allocation6], %s728_s29, %s728_s29, %s729_s30  }
  0x11   : > { %482 = dma.hbm_to_vmem [thread:$0]  (!%p477_p5), %s162_s28, 32, %s164_s5, [#allocation6]  }
  0x12   : > { %p34_p7 = scmp.ge.s32.totalorder %s32_s6, 2  ;;  %s41_s8 = sadd.s32 1, %s713_s14 }
  0x13   : > { %p48_p8 = scmp.ne.s32.totalorder %s713_s14, %s709_s13  ;;  %p49_p9 = scmp.eq.s32.totalorder %s725_s17, 0 }
  0x14   : > { %s911_s6 = smov (%p34_p7, %s32_s6), 0  ;;  %p54_p10 = scmp.ne.s32.totalorder %s709_s13, %s705_s12 }
  0x15   : > { %s36_s9 = ssub.s32 %s721_s16, %s911_s6  ;;  %p122_p11 = scmp.eq.s32.totalorder %s423_s18, 1 }
  0x16   : > { %p39_p12 = scmp.eq.s32.totalorder %s36_s9, 0  ;;  %p821_p13 = por %p785_p1, %p54_p10 }
  0x17   : > { %p825_p0 = por %p122_p11, %p48_p8  ;;  %p128_p2 = scmp.eq.s32.totalorder %s424_s7, 1 }
  0x18   : > { %s830_s20 = scalar_select %p39_p12, %s713_s14, %s41_s8  }
  0x19   : > { %p50_p4 = por %p49_p9, %p48_p8  ;;  %p832_p5 = por %p128_p2, %p54_p10 }
  0x1a   : > { %s174_s22 = sand.u32 1, %s713_s14   ;;  %s430_s18 = sshll.u32 %s721_s16, 2 }
  0x1b   : > { %p493_p7 = scmp.lt.s32.totalorder %s725_s17, 2  ;;  %s429_s24 = sshll.u32 %s174_s22, 2 }
  0x1c   : > { %s183_s27 = scalar_lea.hbm %s896_s0, %s430_s18  ;;  %s178_s29 = scalar_lea.vmem [#allocation2], %s429_s24 }
  0x1d   : > { %s185_s28 = sshll.u32 %s183_s27, 4  ;;  %s187_s30 = sshll.u32 %s178_s29, 4  ;;  %s186_s28 = int_to_ptr.hbm [resolvable:$true] %s185_s28  ;;  %s188_s30 = int_to_ptr.vmem [resolvable:$true] %s187_s30 }
  0x1e   : > { %p484_p11 = pnand %p493_p7, %p50_p4  ;;  %s175_s4 = scalar_lea.sflag [#allocation3], %s174_s22 }
  0x1f   : > { %196 = sbr.rel (%p793_p3) target bundleno = 184 (0xb8), region = 32  ;;  %s845_s5 = sand.u32 (!%p793_p3), 1, %s709_s13  }
  0x20   : > { %486 = dma.hbm_to_vmem [thread:$0]  (!%p484_p11), %s186_s28, 64, %s188_s30, %s175_s4  }
  0x21   : > { %s432_s7 = sshll.u32 (!%p793_p3), %s845_s5, 2  ;;  %s199_s8 = scalar_lea.sflag (!%p793_p3), [#allocation3], %s845_s5 }
  0x22   : > { %s202_s9 = scalar_lea.vmem (!%p793_p3), [#allocation2], %s432_s7 }
  0x24   : > { %692 = dma.done.wait (%p821_p13), %s199_s8, 64  }
  0x25   : > { %694 = vsyncadd (%p821_p13), %s199_s8, 4294967232 }
  0x26   : > { %696 = dma.done.wait (%p785_p1), [#allocation6], 544  }
  0x27   : > { %698 = vsyncadd (%p785_p1), [#allocation6], 4294966752  ;;  %v446_v0 = vld [vmem:[#allocation5 + $0x10] sm:$0xf]  ;;  %v462_v1 = vld [vmem:[#allocation5 + $0x14] sm:$0xf0] }
  0x28   : > { %v461_v2 = vld [vmem:[#allocation5 + $0x14] sm:$0xf]  ;;  %v447_v3 = vor.u32 %v462_v1, %v446_v0  ;;  %v448_v4 = vld [vmem:[#allocation5 + $0x18] sm:$0xf0]  ;;  %v438_v5 = vld [vmem:[#allocation5] sm:$0xf] }
  0x29   : > { %v460_v6 = vld [vmem:[#allocation5 + $0x4] sm:$0xf0]  ;;  %v451_v7 = vor.u32 %v461_v2, %v448_v4  ;;  %v459_v8 = vld [vmem:[#allocation5 + $0x4] sm:$0xf]  ;;  %v440_v9 = vld [vmem:[#allocation5 + $0x8] sm:$0xf0] }
  0x2a   : > { %278 = vmatpush.bf16.msra.mxu0 %v447_v3  ;;  %v439_v10 = vor.u32 %v460_v6, %v438_v5  ;;  %v443_v11 = vor.u32 %v459_v8, %v440_v9  ;;  %v237_v12 = vld [vmem:[%s202_s9] sm:$0xf]  ;;  %vm268_vm0 = vcmask 261120   ;;  %v242_v13 = vld [vmem:[#allocation7] sm:$0x3]  ;;  %s435_s19 = sshll.u32 %s845_s5, 3 }
  0x2b   : > { %291 = vmatpush.bf16.msra.mxu1 %v451_v7  ;;  %s463_s23 = sshll.u32 %s717_s15, 3  ;;  %v244_v14 = vperm.slane %v242_v13, 0  ;;  %v245_v15 = vperm.slane %v242_v13, 1  ;;  %vm299_vm1 = vcmask 1043456   ;;  %vm300_vm2 = vcmask 523268   ;;  %s235_s24 = scalar_lea.vmem [#allocation8], %s435_s19 }
  0x2c   : > { %s317_s18 = scalar_lea.hbm %s899_s3, %s463_s23  ;;  %s319_s25 = sshll.u32 %s235_s24, 4  ;;  %vm301_vm3 = vmor %vm300_vm2, %vm299_vm1  ;;  %s320_s25 = int_to_ptr.vmem [resolvable:$true] %s319_s25 }
  0x2d   : > { %s321_s26 = sshll.u32 %s317_s18, 4  ;;  %s304_s15 = scalar_lea.sflag [#allocation4], %s845_s5  ;;  %s322_s26 = int_to_ptr.hbm [resolvable:$true] %s321_s26 }
  0x2e   : > { %279 = vmatpush.bf16.msra.mxu0 %v439_v10  ;;  %s653_s27 = sshra.s32 %s322_s26, 4  ;;  %s659_s4 = scalar_lea.hbm %s899_s3, 16  ;;  %s654_s27 = int_to_ptr.hbm [resolvable:$true] %s653_s27 }
  0x2f   : > { %292 = vmatpush.bf16.msra.mxu1 %v443_v11  ;;  %s655_s28 = scalar_lea.hbm %s654_s27, 8  ;;  %p660_p9 = scmp.lt.s32.totalorder %s654_s27, %s899_s3 }
  0x30   : > { %p656_p1 = scmp.ne.s32.totalorder %s654_s27, %s655_s28  ;;  %p661_p10 = scmp.lt.s32.totalorder %s659_s4, %s655_s28 }
  0x31   : > { %452 = vmatmul.msk.bf16.vlgmr.msra.gmra.mxu0 %vm268_vm0, %v237_v12 }
  0x32   : > { %453 = vmatmul.msk.bf16.vlgmr.msra.gmra.mxu1 %vm268_vm0, %v237_v12  ;;  %p657_p3 = pnand %p656_p1, %p825_p0  ;;  %p662_p12 = por %p661_p10, %p660_p9 }
  0x34   : > { %p658_p8 = pneg %p657_p3 }
  0x36   : > { %p663_p13 = pnand %p662_p12, %p658_p8 }
  0xae   : > { %v281_v16 = vpop.f32.mrf.mxu0 }
  0xaf   : > { %v282_v17 = vadd.f32 %v281_v16, %v244_v14  ;;  %v294_v18 = vpop.f32.mrf.mxu1 }
  0xb0   : > { %v295_v19 = vadd.f32 %v294_v18, %v245_v15 }
  0xb2   : > { %v298_v20 = vpack.c.bf16 %v295_v19, %v282_v17 }
  0xb4   : > { %302 = vst.msk [vmem:[%s235_s24] sm:$0xff] %vm301_vm3, %v298_v20 }
  0xb5   : > { %666 = shalt.err (!%p663_p13)
}
  0xb6   : > { %474 = dma.vmem_to_hbm [thread:$0]  (%p825_p0), %s320_s25, 128, %s322_s26, %s304_s15   ;;  %v283_v21 = vpop.f32.mrf.mxu0 }
  0xb7   : > { %v296_v22 = vpop.f32.mrf.mxu1 }
  0xb8 PF: > { %s333_s5 = sand.u32 1, %s705_s12   ;;  %p488_p2 = pnand %p428_p6, %p832_p5 }
  0xb9   : > { %s334_s9 = scalar_lea.sflag [#allocation4], %s333_s5 }
  0xba   : > { %p489_p4 = pneg %p488_p2 }
  0xbc   : > { %700 = dma.done.wait (%p489_p4), %s334_s9, 128  }
  0xbd   : > { %702 = vsyncadd (%p489_p4), %s334_s9, 4294967168  ;;  %s20_s17 = sadd.s32 1, %s725_s17   ;;  %s905_s12 = smov %s709_s13 }
  0xbe   : > { %p17_p7 = scmp.ge.s32.totalorder %s20_s17, 4   ;;  %s906_s13 = smov %s713_s14 }
  0xbf   : > { %s907_s14 = smov %s830_s20  ;;  %s908_s15 = smov %s721_s16 }
  0xc0   : > { %s909_s16 = smov %s911_s6  ;;  %19 = sbr.rel (!%p17_p7) target bundleno = 7 (0x7), region = 85 }
  0xc5   :  { %340 = vsyncpa [#allocation3], 1 }
  0xc6   :  { %342 = vsyncpa [#allocation3 + $0x1], 1 }
  0xc7   :  { %343 = vsyncpa [#allocation6], 1 }
  0xc8   :  { %344 = vsyncpa [#allocation4], 1 }
  0xc9   :  { %346 = vsyncpa [#allocation4 + $0x1], 1 }

</bundles_post_ra>
